<compile_context>
chip_gen: v5e
topology: v5e:2x2
jax: 0.10.0
libtpu: 0.0.40
codegen_flags: <defaults>
</compile_context>

<pallas_src>
import jax
import jax.numpy as jnp
from jax.experimental import pallas as pl
from jax.experimental.pallas import tpu as pltpu

BLK_MAX = 512                          # rows gathered per grid step (big tile)
_VMEM_TABLE_BUDGET = 16 * 1024 * 1024  # resident-table path budget (bytes)


def _round_up(x, m):
    return ((x + m - 1) // m) * m


def _gather_kernel(idx_ref, emb_ref, out_ref):
    """out_ref[r, :] = emb_ref[idx_ref[r, 0], :] for the whole tile at once.

    idx_ref : VMEM (BLK, 1) int32 node ids for this output tile
    emb_ref : VMEM (N, D)   full embedding table (single-buffered, resident)
    out_ref : VMEM (BLK, D) output tile
    """
    blk = out_ref.shape[0]
    n = emb_ref.shape[0]
    ids = idx_ref[...]                                          # (BLK, 1)
    cols = jax.lax.broadcasted_iota(jnp.int32, (blk, n), 1)     # (BLK, N)
    onehot = jnp.where(ids == cols, 1.0, 0.0).astype(emb_ref.dtype)
    # One-hot matmul gather: vectorized full-tile result, single lane-dense
    # (BLK, D) store (no per-row 1-sublane masked stores).
    out_ref[...] = jnp.dot(
        onehot, emb_ref[...], preferred_element_type=jnp.float32
    ).astype(out_ref.dtype)


def n2v_forward(embedding, batch=None):
    """Equivalent of Node2Vec.forward(batch): returns embedding[batch].

    embedding : (num_nodes, embedding_dim) float array
    batch     : (B,) integer node indices, or None -> all nodes (module forward)
    """
    N, D = embedding.shape

    # Fast path: forward(None) is an identity gather over all nodes -> the
    # table itself.  A straight copy/return beats any gather kernel.
    if batch is None:
        return embedding

    batch = jnp.asarray(batch, dtype=jnp.int32)
    B = int(batch.shape[0])
    # Clamp indices so a bad id can never address out-of-bounds VMEM.
    batch = jnp.clip(batch, 0, N - 1)

    table_bytes = N * D * embedding.dtype.itemsize
    assert table_bytes <= _VMEM_TABLE_BUDGET and N <= 4096, (
        "resident-table gather path only supports small embedding tables")
    # TODO(synk): for tables too large for VMEM, stream only the gathered rows
    #             from HBM (memory_space=pl.ANY + double-buffered make_async_copy).

    # Tile size: as large as possible (up to BLK_MAX) while sublane-aligned;
    # pad ragged batches up to a multiple of the tile and slice the result back.
    blk = min(BLK_MAX, _round_up(max(B, 1), 8))
    b_pad = _round_up(B, blk)
    idx2d = jnp.pad(batch, (0, b_pad - B)).reshape(b_pad, 1)

    out = pl.pallas_call(
        _gather_kernel,
        out_shape=jax.ShapeDtypeStruct((b_pad, D), embedding.dtype),
        grid=(b_pad // blk,),
        in_specs=[
            pl.BlockSpec((blk, 1), lambda i: (i, 0)),
            # Full table resident in VMEM, single-buffered (it never changes
            # across grid steps), instead of a double-buffered BlockSpec tile.
            pl.BlockSpec(memory_space=pltpu.MemorySpace.VMEM),
        ],
        out_specs=pl.BlockSpec((blk, D), lambda i: (i, 0)),
        compiler_params=pltpu.CompilerParams(
            dimension_semantics=("parallel",),          # v7x: shard over 2 TCs
            vmem_limit_bytes=32 * 1024 * 1024,          # lift v5e's 16 MiB default
        ),
    )(idx2d, embedding)
    return out[:B]


if __name__ == "__main__":
    # Small deterministic setup consistent with N2V.__init__; only the
    # embedding table (num_nodes x embedding_dim) matters for forward().
    num_nodes = 16
    embedding_dim = 128

    key = jax.random.PRNGKey(0)
    k_emb, k_b1, k_b2 = jax.random.split(key, 3)

    # Node2Vec initializes its embedding ~ N(0, 1).
    embedding = jax.random.normal(k_emb, (num_nodes, embedding_dim),
                                  dtype=jnp.float32)

    # (1) Module forward (batch=None): identity gather -> fast path (pure copy).
    z_all = jax.block_until_ready(n2v_forward(embedding))
    assert z_all.shape == (num_nodes, embedding_dim)
    assert jnp.array_equal(z_all, embedding)

    # (2) Pallas kernel on a ragged batch (not a multiple of the tile size).
    B1 = 23
    batch1 = jax.random.randint(k_b1, (B1,), 0, num_nodes, dtype=jnp.int32)
    z1 = jax.block_until_ready(n2v_forward(embedding, batch1))
    ref1 = jnp.take(embedding, batch1, axis=0)
    assert z1.shape == (B1, embedding_dim)
    assert jnp.allclose(z1, ref1, atol=1e-5, rtol=1e-5), "gather mismatch (ragged)"

    # (3) Pallas kernel with a multi-tile grid (B > BLK_MAX), incl. repeats.
    B2 = 1050
    batch2 = jax.random.randint(k_b2, (B2,), 0, num_nodes, dtype=jnp.int32)
    z2 = jax.block_until_ready(n2v_forward(embedding, batch2))
    ref2 = jnp.take(embedding, batch2, axis=0)
    assert jnp.allclose(z2, ref2, atol=1e-5, rtol=1e-5), "gather mismatch (tiled)"

    # (4) Kernel on the explicit arange batch == what forward(None) computes.
    z_ar = jax.block_until_ready(
        n2v_forward(embedding, jnp.arange(num_nodes, dtype=jnp.int32)))
    assert jnp.allclose(z_ar, embedding, atol=1e-5, rtol=1e-5)

    print("KERNEL_OK")
</pallas_src>

<mosaic_0001>
module attributes {stable_mosaic.version = 11 : i64} {
  func.func @_gather_kernel(%arg0: i32, %arg1: memref<24x1xi32, #tpu.memory_space<vmem>>, %arg2: memref<16x128xf32, #tpu.memory_space<vmem>>, %arg3: memref<24x128xf32, #tpu.memory_space<vmem>>) attributes {dimension_semantics = [#tpu.dimension_semantics<parallel>], iteration_bounds = array<i64: 1>, scalar_prefetch = 0 : i64, scratch_operands = 0 : i64, tpu.core_type = #tpu.core_type<tc>, window_params = [{transform_indices = @transform_0, window_bounds = array<i64: 24, 1>}, {pipeline_mode = #tpu.pipeline_mode<synchronous>, transform_indices = @transform_1, window_bounds = array<i64: 16, 128>}, {transform_indices = @transform_2, window_bounds = array<i64: 24, 128>}]} {
    %c0 = arith.constant 0 : index
    %c0_0 = arith.constant 0 : index
    %0 = vector.load %arg1[%c0, %c0_0] : memref<24x1xi32, #tpu.memory_space<vmem>>, vector<24x1xi32>
    %1 = tpu.iota {dimensions = array<i32: 1>} : vector<24x16xi32>
    %2 = vector.broadcast %0 : vector<24x1xi32> to vector<24x16xi32>
    %3 = arith.cmpi eq, %2, %1 : vector<24x16xi32>
    %cst = arith.constant 1.000000e+00 : f32
    %cst_1 = arith.constant 0.000000e+00 : f32
    %4 = vector.broadcast %cst : f32 to vector<24x16xf32>
    %5 = vector.broadcast %cst_1 : f32 to vector<24x16xf32>
    %6 = arith.select %3, %4, %5 : vector<24x16xi1>, vector<24x16xf32>
    %c0_2 = arith.constant 0 : index
    %c0_3 = arith.constant 0 : index
    %7 = vector.load %arg2[%c0_2, %c0_3] : memref<16x128xf32, #tpu.memory_space<vmem>>, vector<16x128xf32>
    %cst_4 = arith.constant dense<0.000000e+00> : vector<24x128xf32>
    %8 = tpu.matmul %6, %7, %cst_4 {dimension_numbers = #tpu.dot_dimension_numbers<[1], [0], [0], [1], [0, 0, 1, 1], [], []>} : vector<24x16xf32>, vector<16x128xf32>, vector<24x128xf32> -> vector<24x128xf32>
    %c0_5 = arith.constant 0 : index
    %c0_6 = arith.constant 0 : index
    %9 = vector.load %arg3[%c0_5, %c0_6] : memref<24x128xf32, #tpu.memory_space<vmem>>, vector<24x128xf32>
    tpu.vector_store %arg3[%c0_5, %c0_6], %8 {strides = array<i32>} : memref<24x128xf32, #tpu.memory_space<vmem>>, vector<24x128xf32>,
    return
  }
  func.func @transform_0(%arg0: i32) -> (i32, i32) {
    %c0_i32 = arith.constant 0 : i32
    %c0_i32_0 = arith.constant 0 : i32
    return %arg0, %c0_i32 : i32, i32
  }
  func.func @transform_1(%arg0: i32) -> (i32, i32) {
    %c0_i32 = arith.constant 0 : i32
    %c0_i32_0 = arith.constant 0 : i32
    %c0_i32_1 = arith.constant 0 : i32
    return %c0_i32, %c0_i32_0 : i32, i32
  }
  func.func @transform_2(%arg0: i32) -> (i32, i32) {
    %c0_i32 = arith.constant 0 : i32
    %c0_i32_0 = arith.constant 0 : i32
    return %arg0, %c0_i32 : i32, i32
  }
}

</mosaic_0001>

<bundles_post_ra>
// kernel: tpu_custom_call.1
= control target key start
LH: loop header
LB: loop body
LE: loop exit
PB: predicated region body
PF: predicated region fallthrough
CT: control target
= control target key end

     0   :  { %v131_v2 = vmov 0   ;;  %s169_s0 = inlined_call_operand.vmem [shape: s32[24,1], index: 0, kind: input, shape index: {}]   ;;  %s170_s1 = inlined_call_operand.vmem [shape: f32[16,128], index: 1, kind: input, shape index: {}]   ;;  %s171_s2 = inlined_call_operand.hbm [shape: f32[24,128], index: 2, kind: output, shape index: {}]  }
   0x1   :  { %v14_v0 = vld [vmem:[%s169_s0 + $0x10] sm:$0xff]  ;;  %v13_v1 = vld [vmem:[%s169_s0 + $0x8] sm:$0xff]  ;;  %103 = vset.pattern.permute.xlu0 %v131_v2  ;;  %104 = vset.pattern.permute.xlu1 %v131_v2 }
   0x2   :  { %v33_v3 = vld [vmem:[%s170_s1 + $0x8] sm:$0xff] }
   0x3   :  { %7 = vsyncpa [#allocation3], 0  ;;  %24 = vperm.xlu0 %103, %v14_v0   ;;  %21 = vperm.xlu1 %104, %v13_v1   ;;  %v12_v4 = vld [vmem:[%s169_s0] sm:$0xff]  ;;  %v15_v6 = vlaneseq  ;;  %vm34_vm0 = vcmask 130048   ;;  %v132_v10 = vmov 0.0   ;;  %s133_s0 = smov [#allocation2]  }
   0x4   :  { %95 = vmatpush.msra.mxu2 %v33_v3  ;;  %58 = vmatpush.msra.mxu0 %v33_v3  ;;  %v32_v5 = vld [vmem:[%s170_s1] sm:$0xff]  ;;  %s77_s1 = sshll.u32 %s133_s0, 4  ;;  %s79_s21 = sshll.u32 %s171_s2, 4  ;;  %s78_s1 = int_to_ptr.vmem [resolvable:$true] %s77_s1  ;;  %s80_s21 = int_to_ptr.hbm [resolvable:$true] %s79_s21 }
   0x5   :  { %94 = vmatpush.msra.mxu1 %v33_v3  ;;  %v16_v7 = vand.u32 127, %v15_v6  ;;  %s134_s22 = smov 128   ;;  %s135_s23 = smov 8  }
   0x6   :  { %97 = vmatpush.msra.mxu2 %v32_v5  ;;  %59 = vmatpush.msra.mxu0 %v32_v5 }
   0x7   :  { %96 = vmatpush.msra.mxu1 %v32_v5 }
   0xb   :  { %18 = vperm.xlu0 %103, %v12_v4  }
  0x75   :  { %v25_v8 = vpop.permute.xlu0 %24  ;;  %v22_v9 = vpop.permute.xlu1 %21 }
  0x76   :  { %vm28_vm1 = vcmp.eq.s32.totalorder %v25_v8, %v16_v7  ;;  %vm27_vm2 = vcmp.eq.s32.totalorder %v22_v9, %v16_v7 }
  0x77   :  { %v31_v11 = vsel %vm28_vm1, 1.0, %v132_v10  ;;  %v30_v12 = vsel %vm27_vm2, 1.0, %v132_v10 }
  0x78   :  { %93 = vmatmul.msk.f32.vlgmr.msra.gmra.mxu2 %vm34_vm0, %v31_v11  ;;  %92 = vmatmul.msk.f32.vlgmr.msra.gmra.mxu1 %vm34_vm0, %v30_v12 }
  0x7d   :  { %v19_v13 = vpop.permute.xlu0 %18 }
  0x7e   :  { %vm26_vm3 = vcmp.eq.s32.totalorder %v19_v13, %v16_v7 }
  0x7f   :  { %v29_v14 = vsel %vm26_vm3, 1.0, %v132_v10 }
  0x80   :  { %91 = vmatmul.msk.f32.vlgmr.msra.gmra.mxu0 %vm34_vm0, %v29_v14 }
  0xf5   :  { %v64_v15 = vpop.f32.mrf.mxu1 }
  0xf6   :  { %71 = vst [vmem:[#allocation2 + $0x8] sm:$0xff] %v64_v15 }
  0xfb   :  { %v67_v16 = vpop.f32.mrf.mxu2 }
  0xfc   :  { %72 = vst [vmem:[#allocation2 + $0x10] sm:$0xff] %v67_v16 }
  0xfd   :  { %v61_v17 = vpop.f32.mrf.mxu0 }
  0xfe   :  { %70 = vst [vmem:[#allocation2] sm:$0xff] %v61_v17 }
  0xff   :  { %85 = dma.vmem_to_hbm [thread:$0]  %s78_s1, 384, %s80_s21, [#allocation3], %s134_s22, %s134_s22, %s135_s23  }
 0x100   :  { %129 = dma.done.wait [#allocation3], 384  }
 0x101   :  { %130 = vsyncadd [#allocation3], 4294966912 }
 0x102   :  { %90 = vsyncpa [#allocation3], 1 }

</bundles_post_ra>
